<compile_context>
chip_gen: v7x
topology: tpu7x:2x2x1
jax: 0.10.0
libtpu: 0.0.40
codegen_flags: <defaults>
</compile_context>

<pallas_src>
import functools

import jax
import jax.numpy as jnp
from jax import lax
from jax.experimental import pallas as pl
from jax.experimental.pallas import tpu as pltpu


def _fc_kernel(x_ref, w_ref, b_ref, o_ref, *, w_lrmul, b_lrmul, neg_slope):
    # MXU: (TM, in) x (out, in) contracted on in -> (TM, out), f32 accumulate.
    acc = lax.dot_general(
        x_ref[...], w_ref[...],
        dimension_numbers=(((1,), (1,)), ((), ())),
        preferred_element_type=jnp.float32)
    # Epilogue in f32 on the VPU: scale accumulator (linearity), add scaled bias.
    acc = acc * w_lrmul + b_ref[...].astype(jnp.float32) * b_lrmul
    # leaky_relu(x, s) == max(x, s*x) for 0 < s < 1.
    out = jnp.maximum(acc, neg_slope * acc)
    o_ref[...] = out.astype(o_ref.dtype)


def _round_up(v, m):
    return ((v + m - 1) // m) * m


def fc_forward(x, weight, bias=None, *, w_lrmul, b_lrmul=1.0,
               neg_slope=0.2, tm=256):
    """Pallas implementation of FC.forward.

    x:      (batch, in_channels)
    weight: (out_channels, in_channels)
    bias:   (out_channels,) or None
    returns (batch, out_channels)
    """
    batch, in_ch = x.shape
    out_ch = weight.shape[0]

    # Pad channels to lane-dense (multiple of 128) and batch to the M tile.
    in_p = _round_up(in_ch, 128)
    out_p = _round_up(out_ch, 128)
    tm_eff = min(int(tm), _round_up(batch, 8))      # multiple of 8
    b_p = _round_up(batch, tm_eff)

    x_p = jnp.pad(x, ((0, b_p - batch), (0, in_p - in_ch)))
    w_p = jnp.pad(weight, ((0, out_p - out_ch), (0, in_p - in_ch)))
    if bias is None:
        bias2d = jnp.zeros((1, out_p), dtype=jnp.float32)
        b_lrmul = 0.0
    else:
        bias2d = jnp.pad(bias, (0, out_p - out_ch)).reshape(1, out_p)

    kernel = functools.partial(
        _fc_kernel, w_lrmul=float(w_lrmul), b_lrmul=float(b_lrmul),
        neg_slope=float(neg_slope))

    grid = (b_p // tm_eff,)

    flops = 2 * b_p * in_p * out_p
    bytes_accessed = int(x_p.size * x_p.dtype.itemsize
                         + w_p.size * w_p.dtype.itemsize
                         + bias2d.size * bias2d.dtype.itemsize
                         + b_p * out_p * x.dtype.itemsize)

    out_padded = pl.pallas_call(
        kernel,
        out_shape=jax.ShapeDtypeStruct((b_p, out_p), x.dtype),
        grid_spec=pltpu.PrefetchScalarGridSpec(
            num_scalar_prefetch=0,
            grid=grid,
            in_specs=[
                # x tile advances with the batch grid index.
                pl.BlockSpec((tm_eff, in_p), lambda i: (i, 0)),
                # Weight stays VMEM-resident (same block every step).
                pl.BlockSpec((out_p, in_p), lambda i: (0, 0)),
                # Bias row stays resident.
                pl.BlockSpec((1, out_p), lambda i: (0, 0)),
            ],
            out_specs=pl.BlockSpec((tm_eff, out_p), lambda i: (i, 0)),
        ),
        compiler_params=pltpu.CompilerParams(
            dimension_semantics=("parallel",)),
        cost_estimate=pl.CostEstimate(
            flops=flops, transcendentals=0, bytes_accessed=bytes_accessed),
    )(x_p, w_p, bias2d)

    return out_padded[:batch, :out_ch]


def make_fc_params(key, in_channels, out_channels, gain=2 ** 0.5,
                   use_wscale=False, lrmul=1.0, bias=True):
    """Deterministic parameter init mirroring FC.__init__."""
    he_std = gain * in_channels ** (-0.5)
    if use_wscale:
        init_std = 1.0 / lrmul
        w_lrmul = he_std * lrmul
    else:
        init_std = he_std / lrmul
        w_lrmul = lrmul
    wkey, _ = jax.random.split(key)
    weight = jax.random.normal(wkey, (out_channels, in_channels),
                               dtype=jnp.float32) * init_std
    if bias:
        b = jnp.zeros((out_channels,), dtype=jnp.float32)
        b_lrmul = lrmul
    else:
        b = None
        b_lrmul = 0.0
    return weight, b, w_lrmul, b_lrmul


if __name__ == "__main__":
    key = jax.random.PRNGKey(0)
    batch, in_channels, out_channels = 8, 32, 64

    kx, kp = jax.random.split(key)
    x = jax.random.normal(kx, (batch, in_channels), dtype=jnp.float32)
    weight, bias, w_lrmul, b_lrmul = make_fc_params(
        kp, in_channels, out_channels, use_wscale=True, lrmul=1.0, bias=True)

    out = fc_forward(x, weight, bias, w_lrmul=w_lrmul, b_lrmul=b_lrmul)
    out = jax.block_until_ready(out)

    # Pure-JAX reference check (same math as F.linear + leaky_relu(0.2)).
    ref = x @ (weight * w_lrmul).T + bias * b_lrmul
    ref = jnp.where(ref >= 0, ref, 0.2 * ref)
    assert out.shape == (batch, out_channels)
    assert jnp.allclose(out, ref, atol=1e-5, rtol=1e-5)

    # Also exercise the bias=False path.
    out_nb = fc_forward(x, weight, None, w_lrmul=w_lrmul)
    out_nb = jax.block_until_ready(out_nb)
    ref_nb = x @ (weight * w_lrmul).T
    ref_nb = jnp.where(ref_nb >= 0, ref_nb, 0.2 * ref_nb)
    assert jnp.allclose(out_nb, ref_nb, atol=1e-5, rtol=1e-5)

    print("KERNEL_OK")
</pallas_src>

<mosaic_0001>
module attributes {stable_mosaic.version = 11 : i64} {
  func.func @_fc_kernel(%arg0: i32, %arg1: memref<8x128xf32, #tpu.memory_space<vmem>>, %arg2: memref<128x128xf32, #tpu.memory_space<vmem>>, %arg3: memref<1x128xf32, #tpu.memory_space<vmem>>, %arg4: memref<8x128xf32, #tpu.memory_space<vmem>>) attributes {dimension_semantics = [#tpu.dimension_semantics<parallel>], iteration_bounds = array<i64: 1>, scalar_prefetch = 0 : i64, scratch_operands = 0 : i64, tpu.core_type = #tpu.core_type<tc>, window_params = [{transform_indices = @transform_0, window_bounds = array<i64: 8, 128>}, {pipeline_mode = #tpu.pipeline_mode<synchronous>, transform_indices = @transform_1, window_bounds = array<i64: 128, 128>}, {pipeline_mode = #tpu.pipeline_mode<synchronous>, transform_indices = @transform_2, window_bounds = array<i64: 1, 128>}, {transform_indices = @transform_3, window_bounds = array<i64: 8, 128>}]} {
    %c0 = arith.constant 0 : index
    %c0_0 = arith.constant 0 : index
    %0 = vector.load %arg1[%c0, %c0_0] : memref<8x128xf32, #tpu.memory_space<vmem>>, vector<8x128xf32>
    %c0_1 = arith.constant 0 : index
    %c0_2 = arith.constant 0 : index
    %1 = vector.load %arg2[%c0_1, %c0_2] : memref<128x128xf32, #tpu.memory_space<vmem>>, vector<128x128xf32>
    %cst = arith.constant dense<0.000000e+00> : vector<8x128xf32>
    %2 = tpu.matmul %0, %1, %cst {dimension_numbers = #tpu.dot_dimension_numbers<[1], [1], [0], [0], [0, 0, 1, 0], [], []>} : vector<8x128xf32>, vector<128x128xf32>, vector<8x128xf32> -> vector<8x128xf32>
    %cst_3 = arith.constant 2.500000e-01 : f32
    %3 = vector.broadcast %cst_3 : f32 to vector<8x128xf32>
    %4 = arith.mulf %2, %3 : vector<8x128xf32>
    %c0_4 = arith.constant 0 : index
    %c0_5 = arith.constant 0 : index
    %5 = vector.load %arg3[%c0_4, %c0_5] : memref<1x128xf32, #tpu.memory_space<vmem>>, vector<1x128xf32>
    %cst_6 = arith.constant 1.000000e+00 : f32
    %6 = vector.broadcast %cst_6 : f32 to vector<1x128xf32>
    %7 = arith.mulf %5, %6 : vector<1x128xf32>
    %8 = vector.broadcast %7 : vector<1x128xf32> to vector<8x128xf32>
    %9 = arith.addf %4, %8 : vector<8x128xf32>
    %cst_7 = arith.constant 2.000000e-01 : f32
    %10 = vector.broadcast %cst_7 : f32 to vector<8x128xf32>
    %11 = arith.mulf %10, %9 : vector<8x128xf32>
    %12 = arith.maximumf %9, %11 : vector<8x128xf32>
    %c0_8 = arith.constant 0 : index
    %c0_9 = arith.constant 0 : index
    %13 = vector.load %arg4[%c0_8, %c0_9] : memref<8x128xf32, #tpu.memory_space<vmem>>, vector<8x128xf32>
    tpu.vector_store %arg4[%c0_8, %c0_9], %12 {strides = array<i32>} : memref<8x128xf32, #tpu.memory_space<vmem>>, vector<8x128xf32>,
    return
  }
  func.func @transform_0(%arg0: i32) -> (i32, i32) {
    %c0_i32 = arith.constant 0 : i32
    %c0_i32_0 = arith.constant 0 : i32
    return %arg0, %c0_i32 : i32, i32
  }
  func.func @transform_1(%arg0: i32) -> (i32, i32) {
    %c0_i32 = arith.constant 0 : i32
    %c0_i32_0 = arith.constant 0 : i32
    %c0_i32_1 = arith.constant 0 : i32
    return %c0_i32, %c0_i32_0 : i32, i32
  }
  func.func @transform_2(%arg0: i32) -> (i32, i32) {
    %c0_i32 = arith.constant 0 : i32
    %c0_i32_0 = arith.constant 0 : i32
    %c0_i32_1 = arith.constant 0 : i32
    return %c0_i32, %c0_i32_0 : i32, i32
  }
  func.func @transform_3(%arg0: i32) -> (i32, i32) {
    %c0_i32 = arith.constant 0 : i32
    %c0_i32_0 = arith.constant 0 : i32
    return %arg0, %c0_i32 : i32, i32
  }
}

</mosaic_0001>

<bundles_post_ra>
// kernel: tpu_custom_call.1
= control target key start
LH: loop header
LB: loop body
LE: loop exit
PB: predicated region body
PF: predicated region fallthrough
CT: control target
= control target key end

     0   :  { %8 = vsyncpa [#allocation3], 0  ;;  %s387_s0 = inlined_call_operand.hbm [shape: f32[8,128], index: 0, kind: input, shape index: {}]   ;;  %s388_s1 = inlined_call_operand.hbm [shape: f32[128,128], index: 1, kind: input, shape index: {}]   ;;  %s389_s2 = inlined_call_operand.vmem [shape: f32[1,128], index: 2, kind: input, shape index: {}]   ;;  %s390_s3 = inlined_call_operand.hbm [shape: f32[8,128], index: 3, kind: output, shape index: {}]  }
   0x1   :  { %9 = vsyncpa [#allocation6], 0 }
   0x2   :  { %10 = vsyncpa [#allocation4], 0  ;;  %s313_s12 = smov [#allocation2]   ;;  %s314_s14 = smov [#allocation5]  }
   0x3   :  { %s17_s13 = sshll.u32 %s313_s12, 4  ;;  %s26_s15 = sshll.u32 %s314_s14, 4  ;;  %s18_s13 = int_to_ptr.vmem [resolvable:$true] %s17_s13  ;;  %s341_s15 = int_to_ptr.vmem [resolvable:$true] %s26_s15 }
   0x4   :  { %s241_s18 = scalar_lea.hbm %s387_s0, 128 }
   0x5   :  { %p242_p0 = scmp.ne.s32.totalorder %s387_s0, %s241_s18  ;;  %p245_p1 = scmp.lt.u32.totalorder %s241_s18, %s387_s0 }
   0x7   :  { %p247_p2 = pnand %p245_p1, %p242_p0 }
   0x9   :  { %250 = shalt.err (!%p247_p2)
}
   0xa   :  { %s251_s23 = scalar_lea.vmem %s18_s13, 128  ;;  %p256_p4 = scmp.lt.s32.totalorder %s18_s13, %s18_s13 }
   0xb   :  { %p252_p3 = scmp.ne.s32.totalorder %s18_s13, %s251_s23  ;;  %p257_p5 = scmp.lt.s32.totalorder %s251_s23, %s251_s23 }
   0xd   :  { %p258_p6 = por %p257_p5, %p256_p4 }
   0xf   :  { %p259_p7 = pnand %p258_p6, %p252_p3 }
  0x11   :  { %262 = shalt.err (!%p259_p7)
}
  0x12   :  { %20 = dma.hbm_to_vmem [thread:$0]  %s387_s0, 128, %s18_s13, [#allocation3]  }
  0x13   :  { %s263_s28 = scalar_lea.hbm %s388_s1, 2048 }
  0x14   :  { %p264_p8 = scmp.ne.s32.totalorder %s388_s1, %s263_s28  ;;  %p267_p9 = scmp.lt.u32.totalorder %s263_s28, %s388_s1 }
  0x16   :  { %p269_p10 = pnand %p267_p9, %p264_p8 }
  0x18   :  { %272 = shalt.err (!%p269_p10)
}
  0x19   :  { %s273_s6 = scalar_lea.vmem %s341_s15, 2048  ;;  %p278_p12 = scmp.lt.s32.totalorder %s341_s15, %s341_s15 }
  0x1a   :  { %p274_p11 = scmp.ne.s32.totalorder %s341_s15, %s273_s6  ;;  %p279_p13 = scmp.lt.s32.totalorder %s273_s6, %s273_s6 }
  0x1c   :  { %p280_p0 = por %p279_p13, %p278_p12 }
  0x1e   :  { %p281_p1 = pnand %p280_p0, %p274_p11 }
  0x20   :  { %284 = shalt.err (!%p281_p1)
}
  0x21   :  { %s315_s0 = smov 128   ;;  %s316_s7 = smov 8  }
  0x22   :  { %32 = dma.hbm_to_vmem [thread:$0]  %s388_s1, 2048, %s341_s15, [#allocation6], %s315_s0, %s315_s0, %s316_s7  }
  0x23   :  { %307 = dma.done.wait [#allocation3], 128  }
  0x24   :  { %308 = vsyncadd [#allocation3], 4294967168 }
  0x25   :  { %309 = dma.done.wait [#allocation6], 2048  }
  0x26   :  { %310 = vsyncadd [#allocation6], 4294965248  ;;  %v317_v0 = vmov 0.0|0.0   ;;  %vm318_vm0 = vmmov 0   ;;  %v319_v1 = vmov 0.0   ;;  %v42_v2 = vld [vmem:[#allocation5] sm:$0xff] }
  0x27   :  { %209 = vmatprep.subr.bf16.mxu0 %v317_v0  ;;  %206 = vmatprep.mubr.msk.f32.mxu0 %vm318_vm0, %v319_v1  ;;  %v43_v3 = vld [vmem:[#allocation5 + $0x8] sm:$0xff]  ;;  %v44_v5 = vld [vmem:[#allocation5 + $0x10] sm:$0xff]  ;;  %v45_v6 = vld [vmem:[#allocation5 + $0x18] sm:$0xff]  ;;  %s320_s11 = smov [#allocation7]  }
  0x28   :  { %v210_v4 = vpack.c.bf16 %v43_v3, %v42_v2  ;;  %v213_v7 = vpack.c.bf16 %v45_v6, %v44_v5  ;;  %v46_v8 = vld [vmem:[#allocation5 + $0x20] sm:$0xff]  ;;  %v47_v9 = vld [vmem:[#allocation5 + $0x28] sm:$0xff]  ;;  %v48_v11 = vld [vmem:[#allocation5 + $0x30] sm:$0xff]  ;;  %s146_s12 = sshll.u32 %s320_s11, 4  ;;  %s147_s12 = int_to_ptr.vmem [resolvable:$true] %s146_s12 }
  0x29   :  { %v216_v10 = vpack.c.bf16 %v47_v9, %v46_v8  ;;  %v49_v12 = vld [vmem:[#allocation5 + $0x38] sm:$0xff]  ;;  %v50_v14 = vld [vmem:[#allocation5 + $0x40] sm:$0xff]  ;;  %v51_v15 = vld [vmem:[#allocation5 + $0x48] sm:$0xff]  ;;  %s285_s13 = scalar_lea.vmem %s147_s12, 128  ;;  %p290_p3 = scmp.lt.s32.totalorder %s147_s12, %s147_s12 }
  0x2a   :  { %211 = vmatpush3.bf16.xpose.msra.mxu0 %v210_v4  ;;  %v219_v13 = vpack.c.bf16 %v49_v12, %v48_v11  ;;  %v222_v16 = vpack.c.bf16 %v51_v15, %v50_v14  ;;  %v52_v17 = vld [vmem:[#allocation5 + $0x50] sm:$0xff]  ;;  %v53_v18 = vld [vmem:[#allocation5 + $0x58] sm:$0xff]  ;;  %v54_v20 = vld [vmem:[#allocation5 + $0x60] sm:$0xff]  ;;  %p286_p2 = scmp.ne.s32.totalorder %s147_s12, %s285_s13  ;;  %p291_p4 = scmp.lt.s32.totalorder %s285_s13, %s285_s13 }
  0x2b   :  { %212 = vmatprep.subr.bf16.mxu0 %v317_v0  ;;  %v225_v19 = vpack.c.bf16 %v53_v18, %v52_v17  ;;  %v55_v21 = vld [vmem:[#allocation5 + $0x68] sm:$0xff]  ;;  %v56_v23 = vld [vmem:[#allocation5 + $0x70] sm:$0xff]  ;;  %v57_v24 = vld [vmem:[#allocation5 + $0x78] sm:$0xff] }
  0x2c   :  { %v228_v22 = vpack.c.bf16 %v55_v21, %v54_v20  ;;  %v231_v25 = vpack.c.bf16 %v57_v24, %v56_v23  ;;  %v41_v26 = vld [vmem:[#allocation2] sm:$0xff]  ;;  %p292_p5 = por %p291_p4, %p290_p3 }
  0x2d   :  { %v156_v28 = vld [vmem:[%s389_s2] ss:$0 sm:$0xff] }
  0x2e   :  { %p293_p6 = pnand %p292_p5, %p286_p2 }
  0x32   :  { %214 = vmatpush3.bf16.xpose.msra.mxu0 %v213_v7 }
  0x33   :  { %215 = vmatprep.subr.bf16.mxu0 %v317_v0 }
  0x3a   :  { %217 = vmatpush3.bf16.xpose.msra.mxu0 %v216_v10 }
  0x3b   :  { %218 = vmatprep.subr.bf16.mxu0 %v317_v0 }
  0x42   :  { %220 = vmatpush3.bf16.xpose.msra.mxu0 %v219_v13 }
  0x43   :  { %221 = vmatprep.subr.bf16.mxu0 %v317_v0 }
  0x4a   :  { %223 = vmatpush3.bf16.xpose.msra.mxu0 %v222_v16 }
  0x4b   :  { %224 = vmatprep.subr.bf16.mxu0 %v317_v0 }
  0x52   :  { %226 = vmatpush3.bf16.xpose.msra.mxu0 %v225_v19 }
  0x53   :  { %227 = vmatprep.subr.bf16.mxu0 %v317_v0 }
  0x5a   :  { %229 = vmatpush3.bf16.xpose.msra.mxu0 %v228_v22 }
  0x5b   :  { %230 = vmatprep.subr.bf16.mxu0 %v317_v0 }
  0x62   :  { %232 = vmatpush3.bf16.xpose.msra.mxu0 %v231_v25 }
  0x69   :  { %207 = vmatmul.mubr.f32.vlgmr.msra.gmra.mrb[0].mxu0 %v41_v26 }
 0x13c   :  { %v124_v27 = vpop.f32.mrb[0].mxu0 }
 0x13d   :  { %v128_v29 = vmul.f32 0.25, %v124_v27  ;;  %v208_v30 = vpop.f32.mrb[1].mxu0 }
 0x13f   :  { %v136_v31 = vadd.f32 %v156_v28, %v128_v29 }
 0x141   :  { %v137_v32 = vmul.f32 0.2, %v136_v31 }
 0x143   :  { %v138_v33 = vmax.f32 %v136_v31, %v137_v32 }
 0x145   :  { %139 = vst [vmem:[#allocation7] sm:$0xff] %v138_v33 }
 0x146   :  { %296 = shalt.err (!%p293_p6)
}
 0x147   :  { %s297_s2 = scalar_lea.hbm %s390_s3, 128 }
 0x148   :  { %p298_p7 = scmp.ne.s32.totalorder %s390_s3, %s297_s2  ;;  %p301_p8 = scmp.lt.u32.totalorder %s297_s2, %s390_s3 }
 0x14a   :  { %p303_p9 = pnand %p301_p8, %p298_p7 }
 0x14c   :  { %306 = shalt.err (!%p303_p9)
}
 0x14d   :  { %149 = dma.vmem_to_hbm [thread:$0]  %s147_s12, 128, %s390_s3, [#allocation4]  }
 0x14e   :  { %311 = dma.done.wait [#allocation4], 128  }
 0x14f   :  { %312 = vsyncadd [#allocation4], 4294967168 }
 0x150   :  { %153 = vsyncpa [#allocation3], 1 }
 0x151   :  { %154 = vsyncpa [#allocation6], 1 }
 0x152   :  { %155 = vsyncpa [#allocation4], 1 }

</bundles_post_ra>
